<compile_context>
chip_gen: v7x
topology: tpu7x:2x2x1
jax: 0.10.0
libtpu: 0.0.40
codegen_flags: <defaults>
</compile_context>

<pallas_src>
import functools

import jax
import jax.numpy as jnp
from jax.experimental import pallas as pl
from jax.experimental.pallas import tpu as pltpu


def _topk_loss_kernel(x_ref, t_ref, contrib_ref, hit_ref, *, k: int):
    x = x_ref[...]                       # [TB, Cp] f32 logits (pad cols = -inf)
    t = t_ref[...]                       # [TB, 1]  i32 targets (pad rows = -1)
    TB, Cp = x.shape
    f32 = jnp.float32
    neg_inf = f32(-jnp.inf)

    col = jax.lax.broadcasted_iota(jnp.int32, (TB, Cp), 1)   # only used pre-loop
    ones_c = jnp.ones((Cp, 1), f32)                          # MXU row-sum helper

    # ---- once per tile: target logit + exact rank (lowest-index tie break) ----
    x_t = jnp.sum(jnp.where(col == t, x, 0.0), axis=1, keepdims=True)       # [TB,1]
    beats = jnp.logical_or(x > x_t,
                           jnp.logical_and(x == x_t, col < t)).astype(f32)  # [TB,Cp]
    rank = jnp.dot(beats, ones_c, preferred_element_type=f32)               # [TB,1] (MXU)
    hit = jnp.logical_and(rank < k, t >= 0).astype(f32)                     # [TB,1]

    # ---- top-k VALUES only: group-masked iterative max ----
    # Per iteration: 1 XLU max-reduce, 1 VALU compare, 1 MXU count, 1 VALU select.
    m1 = jnp.max(x, axis=1, keepdims=True)            # row max == max of top-k (LSE shift)
    work = x
    sum_exp = jnp.zeros((TB, 1), f32)
    selected = jnp.zeros((TB, 1), f32)
    for _ in range(k):
        v = jnp.max(work, axis=1, keepdims=True)                        # [TB,1]
        eq = work == v                                                   # tied group
        cnt = jnp.dot(eq.astype(f32), ones_c, preferred_element_type=f32)  # [TB,1] (MXU)
        take = jnp.maximum(jnp.minimum(cnt, f32(k) - selected), 0.0)
        sum_exp = sum_exp + take * jnp.exp(v - m1)
        selected = selected + take
        work = jnp.where(eq, neg_inf, work)                              # mask whole group

    lse = m1 + jnp.log(sum_exp)                        # [TB,1] log-sum-exp over top-k
    contrib_ref[...] = jnp.where(hit > 0.0, x_t - lse, 0.0)   # logp at target if matched
    hit_ref[...] = hit


def topk_loss(outputs: jax.Array, targets: jax.Array, k: int = 5,
              tile_b: int | None = None) -> jax.Array:
    """outputs: [B, C] float logits; targets: [B] int — returns scalar loss."""
    B, C = outputs.shape
    assert k <= C, "topk requires k <= num_classes"
    x = outputs.astype(jnp.float32)
    t = targets.astype(jnp.int32)

    # Pad class dim to a multiple of 128 lanes with -inf (keeps vector ops unmasked).
    Cp = ((C + 127) // 128) * 128
    if Cp != C:
        x = jnp.pad(x, ((0, 0), (0, Cp - C)), constant_values=-jnp.inf)

    # Batch tile sized for ~6 live [tile_b, Cp] f32 copies inside a 32 MiB scoped-VMEM
    # budget (safe on v7x's smaller VMEM; v5e/v6e have headroom).
    if tile_b is None:
        budget_elems = (32 * 1024 * 1024 // 4) // 6
        tile_b = min(512, max(8, (budget_elems // Cp) // 8 * 8))
    tile_b = max(8, min(tile_b, ((B + 7) // 8) * 8))   # multiple of 8, no bigger than needed

    # Pad batch to a multiple of tile_b (pad rows: logits 0, target -1 -> never counted).
    Bp = ((B + tile_b - 1) // tile_b) * tile_b
    if Bp != B:
        x = jnp.pad(x, ((0, Bp - B), (0, 0)))
        t = jnp.pad(t, (0, Bp - B), constant_values=-1)
    t2 = t.reshape(Bp, 1)
    num_tiles = Bp // tile_b

    contrib, hits = pl.pallas_call(
        functools.partial(_topk_loss_kernel, k=k),
        out_shape=(jax.ShapeDtypeStruct((Bp, 1), jnp.float32),
                   jax.ShapeDtypeStruct((Bp, 1), jnp.float32)),
        grid=(num_tiles,),
        in_specs=[
            pl.BlockSpec((tile_b, Cp), lambda i: (i, 0)),
            pl.BlockSpec((tile_b, 1), lambda i: (i, 0)),
        ],
        out_specs=(
            pl.BlockSpec((tile_b, 1), lambda i: (i, 0)),
            pl.BlockSpec((tile_b, 1), lambda i: (i, 0)),
        ),
        compiler_params=pltpu.CompilerParams(
            dimension_semantics=("parallel",),        # batch tiles shard across TCs (v7x)
            vmem_limit_bytes=32 * 1024 * 1024,
        ),
    )(x, t2)

    total = jnp.sum(contrib)
    count = jnp.sum(hits)
    # loss = -mean over matched entries (NaN if no matches, same as torch's empty .mean())
    return -(total / count)


def _topk_loss_ref(outputs, targets, k=5):
    """Pure-JAX reference mirroring the PyTorch forward."""
    vals, idxs = jax.lax.top_k(outputs, k)                     # [B, k]
    logp = jax.nn.log_softmax(vals, axis=1)                    # [B, k]
    mask = idxs == targets[:, None]
    total = jnp.sum(jnp.where(mask, logp, 0.0))
    count = jnp.sum(mask.astype(jnp.float32))
    return -(total / count)


if __name__ == "__main__":
    key = jax.random.PRNGKey(0)
    kx, kt = jax.random.split(key)
    B, C, K = 8, 32, 5
    outputs = jax.random.normal(kx, (B, C), dtype=jnp.float32)
    targets = jax.random.randint(kt, (B,), 0, C, dtype=jnp.int32)
    # Force some rows to have the target inside the top-k so the mean is non-empty.
    top1 = jnp.argmax(outputs, axis=1)
    targets = targets.at[::2].set(top1[::2])

    loss = topk_loss(outputs, targets, k=K)
    jax.block_until_ready(loss)

    ref = _topk_loss_ref(outputs, targets, k=K)
    assert jnp.allclose(loss, ref, atol=1e-5, rtol=1e-5), (loss, ref)
    print("KERNEL_OK")
</pallas_src>

<mosaic_0001>
module attributes {stable_mosaic.version = 11 : i64} {
  func.func @_topk_loss_kernel(%arg0: i32, %arg1: memref<8x128xf32, #tpu.memory_space<vmem>>, %arg2: memref<8x1xi32, #tpu.memory_space<vmem>>, %arg3: memref<8x1xf32, #tpu.memory_space<vmem>>, %arg4: memref<8x1xf32, #tpu.memory_space<vmem>>) attributes {dimension_semantics = [#tpu.dimension_semantics<parallel>], iteration_bounds = array<i64: 1>, scalar_prefetch = 0 : i64, scratch_operands = 0 : i64, tpu.core_type = #tpu.core_type<tc>, window_params = [{transform_indices = @transform_0, window_bounds = array<i64: 8, 128>}, {transform_indices = @transform_1, window_bounds = array<i64: 8, 1>}, {transform_indices = @transform_2, window_bounds = array<i64: 8, 1>}, {transform_indices = @transform_3, window_bounds = array<i64: 8, 1>}]} {
    %c0 = arith.constant 0 : index
    %c0_0 = arith.constant 0 : index
    %0 = vector.load %arg1[%c0, %c0_0] : memref<8x128xf32, #tpu.memory_space<vmem>>, vector<8x128xf32>
    %c0_1 = arith.constant 0 : index
    %c0_2 = arith.constant 0 : index
    %1 = vector.load %arg2[%c0_1, %c0_2] : memref<8x1xi32, #tpu.memory_space<vmem>>, vector<8x1xi32>
    %2 = tpu.iota {dimensions = array<i32: 1>} : vector<8x128xi32>
    %cst = arith.constant 1.000000e+00 : f32
    %3 = vector.broadcast %cst : f32 to vector<128x1xf32>
    %4 = vector.broadcast %1 : vector<8x1xi32> to vector<8x128xi32>
    %5 = arith.cmpi eq, %2, %4 : vector<8x128xi32>
    %cst_3 = arith.constant 0.000000e+00 : f32
    %6 = vector.broadcast %cst_3 : f32 to vector<8x128xf32>
    %7 = arith.select %5, %0, %6 : vector<8x128xi1>, vector<8x128xf32>
    %cst_4 = arith.constant dense<0.000000e+00> : vector<8xf32>
    %8 = vector.multi_reduction <add>, %7, %cst_4 [1] : vector<8x128xf32> to vector<8xf32>
    %9 = vector.shape_cast %8 : vector<8xf32> to vector<8x1xf32>
    %10 = vector.broadcast %9 : vector<8x1xf32> to vector<8x128xf32>
    %11 = arith.cmpf ogt, %0, %10 : vector<8x128xf32>
    %12 = vector.broadcast %9 : vector<8x1xf32> to vector<8x128xf32>
    %13 = arith.cmpf oeq, %0, %12 : vector<8x128xf32>
    %14 = vector.broadcast %1 : vector<8x1xi32> to vector<8x128xi32>
    %15 = arith.cmpi slt, %2, %14 : vector<8x128xi32>
    %16 = arith.andi %13, %15 : vector<8x128xi1>
    %17 = arith.ori %11, %16 : vector<8x128xi1>
    %18 = arith.extui %17 : vector<8x128xi1> to vector<8x128xi32>
    %19 = arith.sitofp %18 : vector<8x128xi32> to vector<8x128xf32>
    %cst_5 = arith.constant dense<0.000000e+00> : vector<8x1xf32>
    %20 = tpu.matmul %19, %3, %cst_5 {dimension_numbers = #tpu.dot_dimension_numbers<[1], [0], [0], [1], [0, 0, 1, 1], [], []>} : vector<8x128xf32>, vector<128x1xf32>, vector<8x1xf32> -> vector<8x1xf32>
    %cst_6 = arith.constant 5.000000e+00 : f32
    %21 = vector.broadcast %cst_6 : f32 to vector<8x1xf32>
    %22 = arith.cmpf olt, %20, %21 : vector<8x1xf32>
    %c0_i32 = arith.constant 0 : i32
    %23 = vector.broadcast %c0_i32 : i32 to vector<8x1xi32>
    %24 = arith.cmpi sge, %1, %23 : vector<8x1xi32>
    %25 = arith.andi %22, %24 : vector<8x1xi1>
    %26 = arith.extui %25 : vector<8x1xi1> to vector<8x1xi32>
    %27 = arith.sitofp %26 : vector<8x1xi32> to vector<8x1xf32>
    %cst_7 = arith.constant dense<0xFF800000> : vector<8xf32>
    %28 = vector.multi_reduction <maximumf>, %0, %cst_7 [1] : vector<8x128xf32> to vector<8xf32>
    %29 = vector.shape_cast %28 : vector<8xf32> to vector<8x1xf32>
    %cst_8 = arith.constant 0.000000e+00 : f32
    %30 = vector.broadcast %cst_8 : f32 to vector<8x1xf32>
    %cst_9 = arith.constant 0.000000e+00 : f32
    %31 = vector.broadcast %cst_9 : f32 to vector<8x1xf32>
    %cst_10 = arith.constant dense<0xFF800000> : vector<8xf32>
    %32 = vector.multi_reduction <maximumf>, %0, %cst_10 [1] : vector<8x128xf32> to vector<8xf32>
    %33 = vector.shape_cast %32 : vector<8xf32> to vector<8x1xf32>
    %34 = vector.broadcast %33 : vector<8x1xf32> to vector<8x128xf32>
    %35 = arith.cmpf oeq, %0, %34 : vector<8x128xf32>
    %36 = arith.extui %35 : vector<8x128xi1> to vector<8x128xi32>
    %37 = arith.sitofp %36 : vector<8x128xi32> to vector<8x128xf32>
    %cst_11 = arith.constant dense<0.000000e+00> : vector<8x1xf32>
    %38 = tpu.matmul %37, %3, %cst_11 {dimension_numbers = #tpu.dot_dimension_numbers<[1], [0], [0], [1], [0, 0, 1, 1], [], []>} : vector<8x128xf32>, vector<128x1xf32>, vector<8x1xf32> -> vector<8x1xf32>
    %cst_12 = arith.constant 5.000000e+00 : f32
    %39 = vector.broadcast %cst_12 : f32 to vector<8x1xf32>
    %40 = arith.subf %39, %31 : vector<8x1xf32>
    %41 = arith.minimumf %38, %40 : vector<8x1xf32>
    %cst_13 = arith.constant 0.000000e+00 : f32
    %42 = vector.broadcast %cst_13 : f32 to vector<8x1xf32>
    %43 = arith.maximumf %41, %42 : vector<8x1xf32>
    %44 = arith.subf %33, %29 : vector<8x1xf32>
    %45 = math.exp %44 : vector<8x1xf32>
    %46 = arith.mulf %43, %45 : vector<8x1xf32>
    %47 = arith.addf %30, %46 : vector<8x1xf32>
    %48 = arith.addf %31, %43 : vector<8x1xf32>
    %cst_14 = arith.constant 0xFF800000 : f32
    %49 = vector.broadcast %cst_14 : f32 to vector<8x128xf32>
    %50 = arith.select %35, %49, %0 : vector<8x128xi1>, vector<8x128xf32>
    %cst_15 = arith.constant dense<0xFF800000> : vector<8xf32>
    %51 = vector.multi_reduction <maximumf>, %50, %cst_15 [1] : vector<8x128xf32> to vector<8xf32>
    %52 = vector.shape_cast %51 : vector<8xf32> to vector<8x1xf32>
    %53 = vector.broadcast %52 : vector<8x1xf32> to vector<8x128xf32>
    %54 = arith.cmpf oeq, %50, %53 : vector<8x128xf32>
    %55 = arith.extui %54 : vector<8x128xi1> to vector<8x128xi32>
    %56 = arith.sitofp %55 : vector<8x128xi32> to vector<8x128xf32>
    %cst_16 = arith.constant dense<0.000000e+00> : vector<8x1xf32>
    %57 = tpu.matmul %56, %3, %cst_16 {dimension_numbers = #tpu.dot_dimension_numbers<[1], [0], [0], [1], [0, 0, 1, 1], [], []>} : vector<8x128xf32>, vector<128x1xf32>, vector<8x1xf32> -> vector<8x1xf32>
    %cst_17 = arith.constant 5.000000e+00 : f32
    %58 = vector.broadcast %cst_17 : f32 to vector<8x1xf32>
    %59 = arith.subf %58, %48 : vector<8x1xf32>
    %60 = arith.minimumf %57, %59 : vector<8x1xf32>
    %cst_18 = arith.constant 0.000000e+00 : f32
    %61 = vector.broadcast %cst_18 : f32 to vector<8x1xf32>
    %62 = arith.maximumf %60, %61 : vector<8x1xf32>
    %63 = arith.subf %52, %29 : vector<8x1xf32>
    %64 = math.exp %63 : vector<8x1xf32>
    %65 = arith.mulf %62, %64 : vector<8x1xf32>
    %66 = arith.addf %47, %65 : vector<8x1xf32>
    %67 = arith.addf %48, %62 : vector<8x1xf32>
    %cst_19 = arith.constant 0xFF800000 : f32
    %68 = vector.broadcast %cst_19 : f32 to vector<8x128xf32>
    %69 = arith.select %54, %68, %50 : vector<8x128xi1>, vector<8x128xf32>
    %cst_20 = arith.constant dense<0xFF800000> : vector<8xf32>
    %70 = vector.multi_reduction <maximumf>, %69, %cst_20 [1] : vector<8x128xf32> to vector<8xf32>
    %71 = vector.shape_cast %70 : vector<8xf32> to vector<8x1xf32>
    %72 = vector.broadcast %71 : vector<8x1xf32> to vector<8x128xf32>
    %73 = arith.cmpf oeq, %69, %72 : vector<8x128xf32>
    %74 = arith.extui %73 : vector<8x128xi1> to vector<8x128xi32>
    %75 = arith.sitofp %74 : vector<8x128xi32> to vector<8x128xf32>
    %cst_21 = arith.constant dense<0.000000e+00> : vector<8x1xf32>
    %76 = tpu.matmul %75, %3, %cst_21 {dimension_numbers = #tpu.dot_dimension_numbers<[1], [0], [0], [1], [0, 0, 1, 1], [], []>} : vector<8x128xf32>, vector<128x1xf32>, vector<8x1xf32> -> vector<8x1xf32>
    %cst_22 = arith.constant 5.000000e+00 : f32
    %77 = vector.broadcast %cst_22 : f32 to vector<8x1xf32>
    %78 = arith.subf %77, %67 : vector<8x1xf32>
    %79 = arith.minimumf %76, %78 : vector<8x1xf32>
    %cst_23 = arith.constant 0.000000e+00 : f32
    %80 = vector.broadcast %cst_23 : f32 to vector<8x1xf32>
    %81 = arith.maximumf %79, %80 : vector<8x1xf32>
    %82 = arith.subf %71, %29 : vector<8x1xf32>
    %83 = math.exp %82 : vector<8x1xf32>
    %84 = arith.mulf %81, %83 : vector<8x1xf32>
    %85 = arith.addf %66, %84 : vector<8x1xf32>
    %86 = arith.addf %67, %81 : vector<8x1xf32>
    %cst_24 = arith.constant 0xFF800000 : f32
    %87 = vector.broadcast %cst_24 : f32 to vector<8x128xf32>
    %88 = arith.select %73, %87, %69 : vector<8x128xi1>, vector<8x128xf32>
    %cst_25 = arith.constant dense<0xFF800000> : vector<8xf32>
    %89 = vector.multi_reduction <maximumf>, %88, %cst_25 [1] : vector<8x128xf32> to vector<8xf32>
    %90 = vector.shape_cast %89 : vector<8xf32> to vector<8x1xf32>
    %91 = vector.broadcast %90 : vector<8x1xf32> to vector<8x128xf32>
    %92 = arith.cmpf oeq, %88, %91 : vector<8x128xf32>
    %93 = arith.extui %92 : vector<8x128xi1> to vector<8x128xi32>
    %94 = arith.sitofp %93 : vector<8x128xi32> to vector<8x128xf32>
    %cst_26 = arith.constant dense<0.000000e+00> : vector<8x1xf32>
    %95 = tpu.matmul %94, %3, %cst_26 {dimension_numbers = #tpu.dot_dimension_numbers<[1], [0], [0], [1], [0, 0, 1, 1], [], []>} : vector<8x128xf32>, vector<128x1xf32>, vector<8x1xf32> -> vector<8x1xf32>
    %cst_27 = arith.constant 5.000000e+00 : f32
    %96 = vector.broadcast %cst_27 : f32 to vector<8x1xf32>
    %97 = arith.subf %96, %86 : vector<8x1xf32>
    %98 = arith.minimumf %95, %97 : vector<8x1xf32>
    %cst_28 = arith.constant 0.000000e+00 : f32
    %99 = vector.broadcast %cst_28 : f32 to vector<8x1xf32>
    %100 = arith.maximumf %98, %99 : vector<8x1xf32>
    %101 = arith.subf %90, %29 : vector<8x1xf32>
    %102 = math.exp %101 : vector<8x1xf32>
    %103 = arith.mulf %100, %102 : vector<8x1xf32>
    %104 = arith.addf %85, %103 : vector<8x1xf32>
    %105 = arith.addf %86, %100 : vector<8x1xf32>
    %cst_29 = arith.constant 0xFF800000 : f32
    %106 = vector.broadcast %cst_29 : f32 to vector<8x128xf32>
    %107 = arith.select %92, %106, %88 : vector<8x128xi1>, vector<8x128xf32>
    %cst_30 = arith.constant dense<0xFF800000> : vector<8xf32>
    %108 = vector.multi_reduction <maximumf>, %107, %cst_30 [1] : vector<8x128xf32> to vector<8xf32>
    %109 = vector.shape_cast %108 : vector<8xf32> to vector<8x1xf32>
    %110 = vector.broadcast %109 : vector<8x1xf32> to vector<8x128xf32>
    %111 = arith.cmpf oeq, %107, %110 : vector<8x128xf32>
    %112 = arith.extui %111 : vector<8x128xi1> to vector<8x128xi32>
    %113 = arith.sitofp %112 : vector<8x128xi32> to vector<8x128xf32>
    %cst_31 = arith.constant dense<0.000000e+00> : vector<8x1xf32>
    %114 = tpu.matmul %113, %3, %cst_31 {dimension_numbers = #tpu.dot_dimension_numbers<[1], [0], [0], [1], [0, 0, 1, 1], [], []>} : vector<8x128xf32>, vector<128x1xf32>, vector<8x1xf32> -> vector<8x1xf32>
    %cst_32 = arith.constant 5.000000e+00 : f32
    %115 = vector.broadcast %cst_32 : f32 to vector<8x1xf32>
    %116 = arith.subf %115, %105 : vector<8x1xf32>
    %117 = arith.minimumf %114, %116 : vector<8x1xf32>
    %cst_33 = arith.constant 0.000000e+00 : f32
    %118 = vector.broadcast %cst_33 : f32 to vector<8x1xf32>
    %119 = arith.maximumf %117, %118 : vector<8x1xf32>
    %120 = arith.subf %109, %29 : vector<8x1xf32>
    %121 = math.exp %120 : vector<8x1xf32>
    %122 = arith.mulf %119, %121 : vector<8x1xf32>
    %123 = arith.addf %104, %122 : vector<8x1xf32>
    %124 = math.log %123 : vector<8x1xf32>
    %125 = arith.addf %29, %124 : vector<8x1xf32>
    %cst_34 = arith.constant 0.000000e+00 : f32
    %126 = vector.broadcast %cst_34 : f32 to vector<8x1xf32>
    %127 = arith.cmpf ogt, %27, %126 : vector<8x1xf32>
    %128 = arith.subf %9, %125 : vector<8x1xf32>
    %cst_35 = arith.constant 0.000000e+00 : f32
    %129 = vector.broadcast %cst_35 : f32 to vector<8x1xf32>
    %130 = arith.select %127, %128, %129 : vector<8x1xi1>, vector<8x1xf32>
    %c0_36 = arith.constant 0 : index
    %c0_37 = arith.constant 0 : index
    %131 = vector.load %arg3[%c0_36, %c0_37] : memref<8x1xf32, #tpu.memory_space<vmem>>, vector<8x1xf32>
    tpu.vector_store %arg3[%c0_36, %c0_37], %130 {strides = array<i32>} : memref<8x1xf32, #tpu.memory_space<vmem>>, vector<8x1xf32>,
    %c0_38 = arith.constant 0 : index
    %c0_39 = arith.constant 0 : index
    %132 = vector.load %arg4[%c0_38, %c0_39] : memref<8x1xf32, #tpu.memory_space<vmem>>, vector<8x1xf32>
    tpu.vector_store %arg4[%c0_38, %c0_39], %27 {strides = array<i32>} : memref<8x1xf32, #tpu.memory_space<vmem>>, vector<8x1xf32>,
    return
  }
  func.func @transform_0(%arg0: i32) -> (i32, i32) {
    %c0_i32 = arith.constant 0 : i32
    %c0_i32_0 = arith.constant 0 : i32
    return %arg0, %c0_i32 : i32, i32
  }
  func.func @transform_1(%arg0: i32) -> (i32, i32) {
    %c0_i32 = arith.constant 0 : i32
    %c0_i32_0 = arith.constant 0 : i32
    return %arg0, %c0_i32 : i32, i32
  }
  func.func @transform_2(%arg0: i32) -> (i32, i32) {
    %c0_i32 = arith.constant 0 : i32
    %c0_i32_0 = arith.constant 0 : i32
    return %arg0, %c0_i32 : i32, i32
  }
  func.func @transform_3(%arg0: i32) -> (i32, i32) {
    %c0_i32 = arith.constant 0 : i32
    %c0_i32_0 = arith.constant 0 : i32
    return %arg0, %c0_i32 : i32, i32
  }
}

</mosaic_0001>

<bundles_post_ra>
// kernel: tpu_custom_call.1
= control target key start
LH: loop header
LB: loop body
LE: loop exit
PB: predicated region body
PF: predicated region fallthrough
CT: control target
= control target key end

     0   :  { %v986_v1 = vmov 0.0|0.0   ;;  %v987_v2 = vmov 1.0|1.0   ;;  %vm988_vm0 = vmmov 0   ;;  %v989_v3 = vmov 0.0   ;;  %s1206_s0 = inlined_call_operand.vmem [shape: f32[8,128], index: 0, kind: input, shape index: {}]   ;;  %s1207_s1 = inlined_call_operand.vmem [shape: s32[8,1], index: 1, kind: input, shape index: {}]   ;;  %s1208_s3 = inlined_call_operand.vmem [shape: f32[8,1], index: 3, kind: output, shape index: {1}]   ;;  %s1209_s2 = inlined_call_operand.vmem [shape: f32[8,1], index: 2, kind: output, shape index: {0}]  }
   0x1   :  { %v1015_v0 = vld [vmem:[%s1206_s0] sm:$0xff]  ;;  %886 = vmatprep.subr.bf16.mxu1 %v986_v1  ;;  %870 = vmatprep.subr.bf16.mxu0 %v986_v1  ;;  %v990_v5 = vmov 1.0   ;;  %v991_v7 = vmov 0   ;;  %v15_v13 = vlaneseq  ;;  %vm534_vm14 = vcmask 7168  }
   0x2   :  { %106 = vmax.xlane.f32.xlu0 %v1015_v0  ;;  %887 = vmatpush3.bf16.msra.mxu1 %v987_v2  ;;  %v1094_v10 = vld [vmem:[%s1207_s1] sm:$0xff] }
   0x3   :  { %888 = vmatprep.subr.bf16.mxu1 %v986_v1  ;;  %871 = vmatpush3.bf16.msra.mxu0 %v987_v2  ;;  %v16_v15 = vand.u32 127, %v15_v13  ;;  %vm102_vm12 = vcmp.ge.s32.totalorder %v1094_v10, 0 }
   0x4   :  { %872 = vmatprep.subr.bf16.mxu0 %v986_v1  ;;  %727 = vmatprep.mubr.msk.f32.mxu1 %vm988_vm0, %v989_v3 }
   0x5   :  { %692 = vmatprep.mubr.msk.f32.mxu0 %vm988_vm0, %v989_v3  ;;  %972 = vset.pattern.permute.xlu1 %v991_v7 }
   0x6   :  { %889 = vmatpush3.bf16.msra.mxu1 %v987_v2  ;;  %973 = vset.pattern.permute.xlu0 %v991_v7 }
   0x7   :  { %890 = vmatprep.subr.bf16.mxu1 %v986_v1  ;;  %873 = vmatpush3.bf16.msra.mxu0 %v987_v2 }
   0x8   :  { %874 = vmatprep.subr.bf16.mxu0 %v986_v1 }
   0xa   :  { %891 = vmatpush3.bf16.msra.mxu1 %v987_v2 }
   0xb   :  { %892 = vmatprep.subr.bf16.mxu1 %v986_v1  ;;  %875 = vmatpush3.bf16.msra.mxu0 %v987_v2 }
   0xc   :  { %876 = vmatprep.subr.bf16.mxu0 %v986_v1 }
   0xe   :  { %893 = vmatpush3.bf16.msra.mxu1 %v987_v2 }
   0xf   :  { %894 = vmatprep.subr.bf16.mxu1 %v986_v1  ;;  %877 = vmatpush3.bf16.msra.mxu0 %v987_v2 }
  0x10   :  { %878 = vmatprep.subr.bf16.mxu0 %v986_v1 }
  0x12   :  { %895 = vmatpush3.bf16.msra.mxu1 %v987_v2 }
  0x13   :  { %896 = vmatprep.subr.bf16.mxu1 %v986_v1  ;;  %879 = vmatpush3.bf16.msra.mxu0 %v987_v2 }
  0x14   :  { %880 = vmatprep.subr.bf16.mxu0 %v986_v1 }
  0x16   :  { %897 = vmatpush3.bf16.msra.mxu1 %v987_v2 }
  0x17   :  { %898 = vmatprep.subr.bf16.mxu1 %v986_v1  ;;  %881 = vmatpush3.bf16.msra.mxu0 %v987_v2 }
  0x18   :  { %882 = vmatprep.subr.bf16.mxu0 %v986_v1 }
  0x1a   :  { %899 = vmatpush3.bf16.msra.mxu1 %v987_v2 }
  0x1b   :  { %900 = vmatprep.subr.bf16.mxu1 %v986_v1  ;;  %883 = vmatpush3.bf16.msra.mxu0 %v987_v2 }
  0x1c   :  { %884 = vmatprep.subr.bf16.mxu0 %v986_v1 }
  0x1e   :  { %901 = vmatpush3.bf16.msra.mxu1 %v987_v2 }
  0x1f   :  { %918 = vmatprep.subr.bf16.mxu1 %v986_v1  ;;  %885 = vmatpush3.bf16.msra.mxu0 %v987_v2 }
  0x20   :  { %902 = vmatprep.subr.bf16.mxu0 %v986_v1 }
  0x8f   :  { %v1056_v4 = vpop.xlane.xlu0 %106 }
  0x90   :  { %vm108_vm1 = vcmp.eq.f32.partialorder %v1015_v0, %v1056_v4  ;;  %v183_v28 = vsub.f32 %v1056_v4, %v1056_v4 }
  0x91   :  { %728 = vmatmul.mubr.msk.f32.vlgmr.msra.gmra.mrb[0].mxu1 %vm108_vm1, %v990_v5  ;;  %v1062_v6 = vsel %vm108_vm1, -inf, %v1015_v0 }
  0x92   :  { %190 = vmax.xlane.f32.xlu0 %v1062_v6  ;;  %919 = vmatpush3.bf16.msra.mxu1 %v987_v2  ;;  %v184_v30 = vmul.f32 1.442695, %v183_v28 }
  0x93   :  { %920 = vmatprep.subr.bf16.mxu1 %v986_v1  ;;  %797 = vmatprep.mubr.msk.f32.mxu1 %vm988_vm0, %v989_v3 }
  0x94   :  { %974 = vpow2.f32 %v184_v30 }
  0x96   :  { %921 = vmatpush3.bf16.msra.mxu1 %v987_v2 }
  0x97   :  { %922 = vmatprep.subr.bf16.mxu1 %v986_v1 }
  0x9a   :  { %923 = vmatpush3.bf16.msra.mxu1 %v987_v2 }
  0x9b   :  { %924 = vmatprep.subr.bf16.mxu1 %v986_v1 }
  0x9e   :  { %925 = vmatpush3.bf16.msra.mxu1 %v987_v2  ;;  %v975_v40 = vpop.eup %974 }
  0x9f   :  { %926 = vmatprep.subr.bf16.mxu1 %v986_v1 }
  0xa2   :  { %927 = vmatpush3.bf16.msra.mxu1 %v987_v2 }
  0xa3   :  { %928 = vmatprep.subr.bf16.mxu1 %v986_v1 }
  0xa6   :  { %929 = vmatpush3.bf16.msra.mxu1 %v987_v2 }
  0xa7   :  { %930 = vmatprep.subr.bf16.mxu1 %v986_v1 }
  0xaa   :  { %931 = vmatpush3.bf16.msra.mxu1 %v987_v2 }
  0xab   :  { %932 = vmatprep.subr.bf16.mxu1 %v986_v1 }
  0xae   :  { %933 = vmatpush3.bf16.msra.mxu1 %v987_v2 }
  0xaf   :  { %950 = vmatprep.subr.bf16.mxu1 %v986_v1 }
 0x11f   :  { %v1083_v8 = vpop.xlane.xlu0 %190 }
 0x120   :  { %vm192_vm2 = vcmp.eq.f32.partialorder %v1062_v6, %v1083_v8  ;;  %v268_v29 = vsub.f32 %v1083_v8, %v1056_v4 }
 0x121   :  { %v274_v9 = vsel %vm192_vm2, -inf, %v1062_v6 }
 0x122   :  { %275 = vmax.xlane.f32.xlu1 %v274_v9  ;;  %v269_v31 = vmul.f32 1.442695, %v268_v29 }
 0x124   :  { %976 = vpow2.f32 %v269_v31 }
 0x12e   :  { %v977_v42 = vpop.eup %976 }
 0x133   :  { %18 = vperm.xlu1 %972, %v1094_v10  }
 0x164   :  { %v1097_v11 = vpop.f32.mrb[0].mxu1 }
 0x165   :  { %v729_v12 = vpop.f32.mrb[1].mxu1  ;;  %v181_v32 = vmin.f32 %v1097_v11, 5.0 }
 0x167   :  { %v182_v34 = vmax.f32 %v181_v32, 0.0 }
 0x169   :  { %v265_v36 = vsub.f32 5.0, %v182_v34  ;;  %v186_v43 = vmul.f32 %v975_v40, %v182_v34 }
 0x1af   :  { %v1099_v14 = vpop.xlane.xlu1 %275 }
 0x1b0   :  { %vm277_vm3 = vcmp.eq.f32.partialorder %v274_v9, %v1099_v14  ;;  %v353_v33 = vsub.f32 %v1099_v14, %v1056_v4 }
 0x1b1   :  { %798 = vmatmul.mubr.msk.f32.vlgmr.msra.gmra.mrb[2].mxu1 %vm277_vm3, %v990_v5  ;;  %v1103_v16 = vsel %vm277_vm3, -inf, %v274_v9 }
 0x1b2   :  { %360 = vmax.xlane.f32.xlu0 %v1103_v16  ;;  %951 = vmatpush3.bf16.msra.mxu1 %v987_v2  ;;  %v354_v35 = vmul.f32 1.442695, %v353_v33 }
 0x1b3   :  { %v19_v17 = vpop.permute.xlu1 %18  ;;  %952 = vmatprep.subr.bf16.mxu1 %v986_v1  ;;  %867 = vmatprep.mubr.msk.f32.mxu1 %vm988_vm0, %v989_v3 }
 0x1b4   :  { %vm20_vm4 = vcmp.eq.s32.totalorder %v16_v15, %v19_v17  ;;  %vm26_vm5 = vcmp.lt.s32.totalorder %v16_v15, %v19_v17  ;;  %978 = vpow2.f32 %v354_v35 }
 0x1b5   :  { %v21_v18 = vsel %vm20_vm4, %v1015_v0, 0.0 }
 0x1b6   :  { %22 = vadd.xlane.f32.xlu0 %v21_v18  ;;  %953 = vmatpush3.bf16.msra.mxu1 %v987_v2 }
 0x1b7   :  { %954 = vmatprep.subr.bf16.mxu1 %v986_v1 }
 0x1ba   :  { %955 = vmatpush3.bf16.msra.mxu1 %v987_v2 }
 0x1bb   :  { %956 = vmatprep.subr.bf16.mxu1 %v986_v1 }
 0x1be   :  { %957 = vmatpush3.bf16.msra.mxu1 %v987_v2  ;;  %v979_v50 = vpop.eup %978 }
 0x1bf   :  { %958 = vmatprep.subr.bf16.mxu1 %v986_v1 }
 0x1c2   :  { %959 = vmatpush3.bf16.msra.mxu1 %v987_v2 }
 0x1c3   :  { %960 = vmatprep.subr.bf16.mxu1 %v986_v1 }
 0x1c6   :  { %961 = vmatpush3.bf16.msra.mxu1 %v987_v2 }
 0x1c7   :  { %962 = vmatprep.subr.bf16.mxu1 %v986_v1 }
 0x1ca   :  { %963 = vmatpush3.bf16.msra.mxu1 %v987_v2 }
 0x1cb   :  { %964 = vmatprep.subr.bf16.mxu1 %v986_v1 }
 0x1ce   :  { %965 = vmatpush3.bf16.msra.mxu1 %v987_v2 }
 0x23f   :  { %v1124_v19 = vpop.xlane.xlu0 %360 }
 0x240   :  { %vm362_vm6 = vcmp.eq.f32.partialorder %v1103_v16, %v1124_v19  ;;  %v438_v54 = vsub.f32 %v1124_v19, %v1056_v4 }
 0x241   :  { %v444_v20 = vsel %vm362_vm6, -inf, %v1103_v16 }
 0x242   :  { %445 = vmax.xlane.f32.xlu0 %v444_v20  ;;  %v439_v55 = vmul.f32 1.442695, %v438_v54 }
 0x243   :  { %v1132_v21 = vpop.xlane.xlu0 %22 }
 0x244   :  { %vm24_vm7 = vcmp.gt.f32.partialorder %v1015_v0, %v1132_v21  ;;  %vm25_vm8 = vcmp.eq.f32.partialorder %v1015_v0, %v1132_v21  ;;  %980 = vpow2.f32 %v439_v55 }
 0x245   :  { %vm27_vm9 = vmand %vm25_vm8, %vm26_vm5 }
 0x246   :  { %vm28_vm10 = vmor %vm24_vm7, %vm27_vm9 }
 0x247   :  { %693 = vmatmul.mubr.msk.f32.vlgmr.msra.gmra.mrb[0].mxu0 %vm28_vm10, %v990_v5 }
 0x248   :  { %903 = vmatpush3.bf16.msra.mxu0 %v987_v2  ;;  %762 = vmatprep.mubr.msk.f32.mxu0 %vm988_vm0, %v989_v3 }
 0x249   :  { %904 = vmatprep.subr.bf16.mxu0 %v986_v1 }
 0x24c   :  { %905 = vmatpush3.bf16.msra.mxu0 %v987_v2 }
 0x24d   :  { %906 = vmatprep.subr.bf16.mxu0 %v986_v1 }
 0x24e   :  { %v981_v61 = vpop.eup %980 }
 0x250   :  { %907 = vmatpush3.bf16.msra.mxu0 %v987_v2 }
 0x251   :  { %908 = vmatprep.subr.bf16.mxu0 %v986_v1 }
 0x254   :  { %909 = vmatpush3.bf16.msra.mxu0 %v987_v2 }
 0x255   :  { %910 = vmatprep.subr.bf16.mxu0 %v986_v1 }
 0x258   :  { %911 = vmatpush3.bf16.msra.mxu0 %v987_v2 }
 0x259   :  { %912 = vmatprep.subr.bf16.mxu0 %v986_v1 }
 0x25c   :  { %913 = vmatpush3.bf16.msra.mxu0 %v987_v2 }
 0x25d   :  { %914 = vmatprep.subr.bf16.mxu0 %v986_v1 }
 0x260   :  { %915 = vmatpush3.bf16.msra.mxu0 %v987_v2 }
 0x261   :  { %916 = vmatprep.subr.bf16.mxu0 %v986_v1 }
 0x264   :  { %917 = vmatpush3.bf16.msra.mxu0 %v987_v2 }
 0x265   :  { %934 = vmatprep.subr.bf16.mxu0 %v986_v1 }
 0x267   :  { %763 = vmatmul.mubr.msk.f32.vlgmr.msra.gmra.mrb[2].mxu0 %vm192_vm2, %v990_v5 }
 0x268   :  { %935 = vmatpush3.bf16.msra.mxu0 %v987_v2  ;;  %832 = vmatprep.mubr.msk.f32.mxu0 %vm988_vm0, %v989_v3 }
 0x269   :  { %936 = vmatprep.subr.bf16.mxu0 %v986_v1 }
 0x26c   :  { %937 = vmatpush3.bf16.msra.mxu0 %v987_v2 }
 0x26d   :  { %938 = vmatprep.subr.bf16.mxu0 %v986_v1 }
 0x270   :  { %939 = vmatpush3.bf16.msra.mxu0 %v987_v2 }
 0x271   :  { %940 = vmatprep.subr.bf16.mxu0 %v986_v1 }
 0x274   :  { %941 = vmatpush3.bf16.msra.mxu0 %v987_v2 }
 0x275   :  { %942 = vmatprep.subr.bf16.mxu0 %v986_v1 }
 0x278   :  { %943 = vmatpush3.bf16.msra.mxu0 %v987_v2 }
 0x279   :  { %944 = vmatprep.subr.bf16.mxu0 %v986_v1 }
 0x27c   :  { %945 = vmatpush3.bf16.msra.mxu0 %v987_v2 }
 0x27d   :  { %946 = vmatprep.subr.bf16.mxu0 %v986_v1 }
 0x280   :  { %947 = vmatpush3.bf16.msra.mxu0 %v987_v2 }
 0x281   :  { %948 = vmatprep.subr.bf16.mxu0 %v986_v1 }
 0x284   :  { %949 = vmatpush3.bf16.msra.mxu0 %v987_v2  ;;  %v346_v22 = vpop.f32.mrb[2].mxu1 }
 0x285   :  { %v799_v23 = vpop.f32.mrb[3].mxu1 }
 0x287   :  { %833 = vmatmul.mubr.msk.f32.vlgmr.msra.gmra.mrb[4].mxu0 %vm362_vm6, %v990_v5 }
 0x2cf   :  { %v446_v24 = vpop.xlane.xlu0 %445 }
 0x2d0   :  { %vm447_vm11 = vcmp.eq.f32.partialorder %v444_v20, %v446_v24  ;;  %v523_v1 = vsub.f32 %v446_v24, %v1056_v4 }
 0x2d1   :  { %868 = vmatmul.mubr.msk.f32.vlgmr.msra.gmra.mrb[4].mxu1 %vm447_vm11, %v990_v5 }
 0x2d2   :  { %v524_v2 = vmul.f32 1.442695, %v523_v1 }
 0x2d4   :  { %982 = vpow2.f32 %v524_v2 }
 0x2de   :  { %v983_v9 = vpop.eup %982 }
 0x31a   :  { %v97_v25 = vpop.f32.mrb[0].mxu0 }
 0x31b   :  { %vm101_vm13 = vcmp.lt.f32.partialorder %v97_v25, 5.0  ;;  %v694_v26 = vpop.f32.mrb[1].mxu0 }
 0x31c   :  { %vm103_vm15 = vmand %vm101_vm13, %vm102_vm12 }
 0x31d   :  { %v547_v27 = vsel %vm103_vm15, 1.0, %v989_v3 }
 0x31e   :  { %536 = vst.msk [vmem:[%s1208_s3] sm:$0xff] %vm534_vm14, %v547_v27  ;;  %vm531_vm0 = vcmp.gt.f32.partialorder %v547_v27, 0.0 }
 0x33a   :  { %v261_v37 = vpop.f32.mrb[2].mxu0 }
 0x33b   :  { %v266_v38 = vmin.f32 %v261_v37, %v265_v36  ;;  %v764_v39 = vpop.f32.mrb[3].mxu0 }
 0x33d   :  { %v267_v41 = vmax.f32 %v266_v38, 0.0 }
 0x33f   :  { %v271_v44 = vmul.f32 %v977_v42, %v267_v41  ;;  %v273_v45 = vadd.f32 %v267_v41, %v182_v34 }
 0x341   :  { %v272_v46 = vadd.f32 %v271_v44, %v186_v43  ;;  %v350_v47 = vsub.f32 5.0, %v273_v45 }
 0x343   :  { %v351_v48 = vmin.f32 %v346_v22, %v350_v47 }
 0x345   :  { %v352_v49 = vmax.f32 %v351_v48, 0.0 }
 0x347   :  { %v356_v51 = vmul.f32 %v979_v50, %v352_v49  ;;  %v358_v52 = vadd.f32 %v352_v49, %v273_v45 }
 0x349   :  { %v357_v53 = vadd.f32 %v356_v51, %v272_v46  ;;  %v435_v56 = vsub.f32 5.0, %v358_v52 }
 0x35a   :  { %v431_v57 = vpop.f32.mrb[4].mxu0 }
 0x35b   :  { %v436_v58 = vmin.f32 %v431_v57, %v435_v56  ;;  %v834_v59 = vpop.f32.mrb[5].mxu0 }
 0x35d   :  { %v437_v60 = vmax.f32 %v436_v58, 0.0 }
 0x35f   :  { %v441_v62 = vmul.f32 %v981_v61, %v437_v60  ;;  %v443_v63 = vadd.f32 %v437_v60, %v358_v52 }
 0x361   :  { %v442_v0 = vadd.f32 %v441_v62, %v357_v53  ;;  %v520_v3 = vsub.f32 5.0, %v443_v63 }
 0x3a4   :  { %v516_v5 = vpop.f32.mrb[4].mxu1 }
 0x3a5   :  { %v521_v6 = vmin.f32 %v516_v5, %v520_v3  ;;  %v869_v7 = vpop.f32.mrb[5].mxu1 }
 0x3a7   :  { %v522_v8 = vmax.f32 %v521_v6, 0.0 }
 0x3a9   :  { %v526_v10 = vmul.f32 %v983_v9, %v522_v8 }
 0x3ab   :  { %v527_v11 = vadd.f32 %v526_v10, %v442_v0 }
 0x3ad   :  { %984 = vlog2.f32 %v527_v11 }
 0x3b7   :  { %v985_v12 = vpop.eup %984 }
 0x3b8   :  { %v529_v13 = vmul.f32 0.6931472, %v985_v12 }
 0x3ba   :  { %v530_v14 = vadd.f32 %v529_v13, %v1056_v4 }
 0x3bc   :  { %v532_v15 = vsub.f32 %v1132_v21, %v530_v14 }
 0x3be   :  { %v533_v16 = vsel %vm531_vm0, %v532_v15, 0.0 }
 0x3bf   :  { %535 = vst.msk [vmem:[%s1209_s2] sm:$0xff] %vm534_vm14, %v533_v16 }

</bundles_post_ra>
